<compile_context>
chip_gen: v7x
topology: tpu7x:2x2x1
jax: 0.10.0
libtpu: 0.0.40
codegen_flags: <defaults>
</compile_context>

<pallas_src>
import jax
import jax.numpy as jnp
import numpy as np
from jax import lax
from jax.experimental import pallas as pl
from jax.experimental.pallas import tpu as pltpu

EPS = 1e-5
LANE = 128
VMEM_LIMIT = 32 * 1024 * 1024


def _round_up(c):
    return ((c + LANE - 1) // LANE) * LANE


# ---------------------------------------------------------------------------
# Kernels (all operate on one (1, H, W, Cpad) image tile; grid = batch axis)
# ---------------------------------------------------------------------------

def stats_kernel(x_ref, st_ref):
    """Per-tile partial sum / sum-of-squares per channel (for BN1)."""
    _, H, W, C = x_ref.shape
    xf = x_ref[...].reshape(H * W, C)
    s = jnp.sum(xf, axis=0, keepdims=True)
    ss = jnp.sum(xf * xf, axis=0, keepdims=True)
    st_ref[...] = jnp.concatenate([s, ss], axis=0)[None]


def conv1_kernel(x_ref, sc_ref, bi_ref, w1_ref, h1_ref, st_ref):
    """Folded BN1 + ReLU + 1x1 conv; emits h1 (bf16) + BN2 partial stats."""
    _, H, W, Cin = x_ref.shape
    Cmid = w1_ref.shape[1]
    xf = x_ref[...].reshape(H * W, Cin)
    a = jnp.maximum(xf * sc_ref[...] + bi_ref[...], 0.0).astype(jnp.bfloat16)
    h = jnp.dot(a, w1_ref[...], preferred_element_type=jnp.float32)
    st_ref[...] = jnp.concatenate(
        [jnp.sum(h, axis=0, keepdims=True),
         jnp.sum(h * h, axis=0, keepdims=True)], axis=0)[None]
    h1_ref[...] = h.astype(jnp.bfloat16).reshape(1, H, W, Cmid)


def conv2_kernel(h1_ref, sc_ref, bi_ref, w2_ref, h2_ref, st_ref):
    """Folded BN2 + ReLU + 3x3 conv.  im2col over the 3 column taps
    (K = 3*Cmid), one MXU matmul per row tap; the row shift is applied to the
    narrow (M, Cmid) f32 results, not to extra copies of the wide operand."""
    _, H, W, C = h1_ref.shape
    M = H * W
    a = jnp.maximum(
        h1_ref[...].astype(jnp.float32).reshape(H, W, C) * sc_ref[...]
        + bi_ref[...], 0.0).astype(jnp.bfloat16)
    # Column taps: concat the 3 column shifts along channels -> (H, W, 3C),
    # in kw order 0,1,2 (input pixel j-1, j, j+1), matching the packed w2r.
    zc = jnp.zeros((H, 1, C), jnp.bfloat16)
    left = jnp.concatenate([zc, a[:, :W - 1, :]], axis=1)    # (i,j) -> a[i, j-1]
    right = jnp.concatenate([a[:, 1:, :], zc], axis=1)       # (i,j) -> a[i, j+1]
    cols = jnp.concatenate([left, a, right], axis=-1).reshape(M, 3 * C)
    # One deep matmul per row tap, all reusing the same im2col operand.
    t0 = jnp.dot(cols, w2_ref[0], preferred_element_type=jnp.float32)  # needs row i-1
    t1 = jnp.dot(cols, w2_ref[1], preferred_element_type=jnp.float32)  # row i
    t2 = jnp.dot(cols, w2_ref[2], preferred_element_type=jnp.float32)  # needs row i+1
    zr = jnp.zeros((W, C), jnp.float32)
    acc = (t1
           + jnp.concatenate([zr, t0[:M - W]], axis=0)     # out[m] += t0[m-W]
           + jnp.concatenate([t2[W:], zr], axis=0))        # out[m] += t2[m+W]
    st_ref[...] = jnp.concatenate(
        [jnp.sum(acc, axis=0, keepdims=True),
         jnp.sum(acc * acc, axis=0, keepdims=True)], axis=0)[None]
    h2_ref[...] = acc.astype(jnp.bfloat16).reshape(1, H, W, C)


def out_kernel(h2_ref, x_ref, sc_ref, bi_ref, w3_ref, ws_ref, o_ref):
    """Folded BN3 + ReLU + 1x1 conv + 1x1 skip conv + residual add."""
    _, H, W, Cmid = h2_ref.shape
    Cin = x_ref.shape[-1]
    Cout = w3_ref.shape[1]
    M = H * W
    hf = h2_ref[...].astype(jnp.float32).reshape(M, Cmid)
    a = jnp.maximum(hf * sc_ref[...] + bi_ref[...], 0.0).astype(jnp.bfloat16)
    main = jnp.dot(a, w3_ref[...], preferred_element_type=jnp.float32)
    xf = x_ref[...].reshape(M, Cin).astype(jnp.bfloat16)
    skip = jnp.dot(xf, ws_ref[...], preferred_element_type=jnp.float32)
    o_ref[...] = (main + skip).reshape(1, H, W, Cout)


# ---------------------------------------------------------------------------
# Wrapper
# ---------------------------------------------------------------------------

def prepare_params(params):
    """One-time packing: zero-pad channels to lane-dense multiples of 128 and
    cast matmul weights to bf16 (w2 repacked as (3, 3*Cmid, Cmid) im2col rows)."""
    cin, cmid = params['w1'].shape
    cout = params['w3'].shape[1]
    CIN, CMID, COUT = _round_up(cin), _round_up(cmid), _round_up(cout)

    def padmat(w, r, c):
        m = jnp.zeros((r, c), jnp.float32).at[:w.shape[0], :w.shape[1]].set(w)
        return m.astype(jnp.bfloat16)

    def padvec(v, c):
        return jnp.zeros((c,), jnp.float32).at[:v.shape[-1]].set(v.reshape(-1))

    w2p = jnp.zeros((3, 3, CMID, CMID), jnp.float32)
    w2p = w2p.at[:, :, :cmid, :cmid].set(params['w2'])
    w2r = w2p.reshape(3, 3 * CMID, CMID).astype(jnp.bfloat16)

    return dict(
        dims=(cin, cmid, cout, CIN, CMID, COUT),
        g1=padvec(params['g1'], CIN), b1=padvec(params['b1'], CIN),
        g2=padvec(params['g2'], CMID), b2=padvec(params['b2'], CMID),
        g3=padvec(params['g3'], CMID), b3=padvec(params['b3'], CMID),
        w1=padmat(params['w1'], CIN, CMID),
        w2r=w2r,
        w3=padmat(params['w3'], CMID, COUT),
        ws=padmat(params['ws'], CIN, COUT),
    )


def bottleneck_block_nchw(x_nchw, packed):
    """NCHW in / NCHW out (PyTorch convention)."""
    cin, cmid, cout, CIN, CMID, COUT = packed['dims']
    N, C, H, W = x_nchw.shape
    # TODO(synk): in a real model keep activations NHWC + channel-padded
    # end-to-end so this boundary transpose/pad is amortized across blocks.
    x = jnp.transpose(x_nchw, (0, 2, 3, 1)).astype(jnp.float32)
    x = jnp.pad(x, ((0, 0), (0, 0), (0, 0), (0, CIN - C)))

    count = float(N * H * W)
    cparams = pltpu.CompilerParams(dimension_semantics=("parallel",),
                                   vmem_limit_bytes=VMEM_LIMIT)

    img = lambda Cc: pl.BlockSpec((1, H, W, Cc), lambda n: (n, 0, 0, 0))
    vec = lambda Cc: pl.BlockSpec((1, Cc), lambda n: (0, 0))
    mat = lambda s: pl.BlockSpec(s, lambda n: (0,) * len(s))
    stat = lambda Cc: pl.BlockSpec((1, 2, Cc), lambda n: (n, 0, 0))

    def bn_fold(part, g, b):
        # Reduce per-tile partial sums and fold BN into one scale/bias (f32).
        tot = jnp.sum(part, axis=0)                       # (2, Cp)
        mean = tot[0] / count
        var = jnp.maximum(tot[1] / count - mean * mean, 0.0)   # biased var, f32
        scale = g * lax.rsqrt(var + EPS)
        bias = b - mean * scale
        return scale.reshape(1, -1), bias.reshape(1, -1)

    # Pass 1: BN1 statistics of x.
    st1 = pl.pallas_call(
        stats_kernel,
        grid=(N,),
        in_specs=[img(CIN)],
        out_specs=stat(CIN),
        out_shape=jax.ShapeDtypeStruct((N, 2, CIN), jnp.float32),
        compiler_params=cparams,
        cost_estimate=pl.CostEstimate(
            flops=2 * N * H * W * CIN, transcendentals=0,
            bytes_accessed=N * H * W * CIN * 4),
    )(x)
    sc1, bi1 = bn_fold(st1, packed['g1'], packed['b1'])

    # Pass 2: BN1 + ReLU + 1x1 conv, emits h1 (bf16) + BN2 stats.
    h1, st2 = pl.pallas_call(
        conv1_kernel,
        grid=(N,),
        in_specs=[img(CIN), vec(CIN), vec(CIN), mat((CIN, CMID))],
        out_specs=(img(CMID), stat(CMID)),
        out_shape=(jax.ShapeDtypeStruct((N, H, W, CMID), jnp.bfloat16),
                   jax.ShapeDtypeStruct((N, 2, CMID), jnp.float32)),
        compiler_params=cparams,
        cost_estimate=pl.CostEstimate(
            flops=2 * N * H * W * CIN * CMID, transcendentals=0,
            bytes_accessed=N * H * W * (CIN * 4 + CMID * 2)),
    )(x, sc1, bi1, packed['w1'])
    sc2, bi2 = bn_fold(st2, packed['g2'], packed['b2'])

    # Pass 3: BN2 + ReLU + 3x3 conv (im2col), emits h2 (bf16) + BN3 stats.
    h2, st3 = pl.pallas_call(
        conv2_kernel,
        grid=(N,),
        in_specs=[img(CMID), vec(CMID), vec(CMID), mat((3, 3 * CMID, CMID))],
        out_specs=(img(CMID), stat(CMID)),
        out_shape=(jax.ShapeDtypeStruct((N, H, W, CMID), jnp.bfloat16),
                   jax.ShapeDtypeStruct((N, 2, CMID), jnp.float32)),
        compiler_params=cparams,
        cost_estimate=pl.CostEstimate(
            flops=2 * N * H * W * 9 * CMID * CMID, transcendentals=0,
            bytes_accessed=N * H * W * CMID * 4),
    )(h1, sc2, bi2, packed['w2r'])
    sc3, bi3 = bn_fold(st3, packed['g3'], packed['b3'])

    # Pass 4: BN3 + ReLU + 1x1 conv + 1x1 skip conv + add.
    out = pl.pallas_call(
        out_kernel,
        grid=(N,),
        in_specs=[img(CMID), img(CIN), vec(CMID), vec(CMID),
                  mat((CMID, COUT)), mat((CIN, COUT))],
        out_specs=img(COUT),
        out_shape=jax.ShapeDtypeStruct((N, H, W, COUT), jnp.float32),
        compiler_params=cparams,
        cost_estimate=pl.CostEstimate(
            flops=2 * N * H * W * (CMID + CIN) * COUT, transcendentals=0,
            bytes_accessed=N * H * W * (CMID * 2 + CIN * 4 + COUT * 4)),
    )(h2, x, sc3, bi3, packed['w3'], packed['ws'])

    out = out[..., :cout]                    # drop channel padding
    return jnp.transpose(out, (0, 3, 1, 2))  # back to NCHW


# ---------------------------------------------------------------------------
# Pure-JAX f32 reference (matches the PyTorch module forward)
# ---------------------------------------------------------------------------

def ref_forward_nchw(x_nchw, params):
    x = jnp.transpose(x_nchw, (0, 2, 3, 1))

    def bn_relu(h, g, b):
        m = jnp.mean(h, axis=(0, 1, 2), keepdims=True)
        v = jnp.mean((h - m) ** 2, axis=(0, 1, 2), keepdims=True)
        return jnp.maximum((h - m) * lax.rsqrt(v + EPS) * g + b, 0.0)

    h = bn_relu(x, params['g1'], params['b1'])
    h = jnp.einsum('nhwc,cd->nhwd', h, params['w1'])
    h = bn_relu(h, params['g2'], params['b2'])
    h = lax.conv_general_dilated(h, params['w2'], window_strides=(1, 1),
                                 padding='SAME',
                                 dimension_numbers=('NHWC', 'HWIO', 'NHWC'))
    h = bn_relu(h, params['g3'], params['b3'])
    main = jnp.einsum('nhwc,cd->nhwd', h, params['w3'])
    skip = jnp.einsum('nhwc,cd->nhwd', x, params['ws'])
    return jnp.transpose(main + skip, (0, 3, 1, 2))


def init_params(key, in_channels, out_channels, expansion):
    cin = in_channels * expansion
    cmid = out_channels                  # mid_channels defaults to out_channels
    cout = out_channels * expansion
    ks = jax.random.split(key, 10)

    def nrm(k, shape, scale=0.1):
        return scale * jax.random.normal(k, shape, jnp.float32)

    return dict(
        g1=1.0 + nrm(ks[0], (cin,)), b1=nrm(ks[1], (cin,)),
        w1=nrm(ks[2], (cin, cmid)),
        g2=1.0 + nrm(ks[3], (cmid,)), b2=nrm(ks[4], (cmid,)),
        w2=nrm(ks[5], (3, 3, cmid, cmid)),
        g3=1.0 + nrm(ks[6], (cmid,)), b3=nrm(ks[7], (cmid,)),
        w3=nrm(ks[8], (cmid, cout)),
        ws=nrm(ks[9], (cin, cout)),
    )


if __name__ == "__main__":
    in_channels, out_channels, expansion = 4, 8, 4
    N, H, W = 2, 16, 16

    key = jax.random.PRNGKey(0)
    kx, kp = jax.random.split(key)
    # NCHW input; channel dim = in_channels * expansion_factor (block contract).
    x = jax.random.normal(kx, (N, in_channels * expansion, H, W), jnp.float32)
    params = init_params(kp, in_channels, out_channels, expansion)
    packed = prepare_params(params)

    out = bottleneck_block_nchw(x, packed)
    out = jax.block_until_ready(out)
    assert out.shape == (N, out_channels * expansion, H, W)

    ref = ref_forward_nchw(x, params)
    # Kernel uses bf16 MXU operands (f32 accumulation / f32 BN statistics);
    # compare against the pure-f32 reference with a bf16-appropriate tolerance.
    np.testing.assert_allclose(np.asarray(out), np.asarray(ref),
                               rtol=2e-2, atol=2e-2)
    print("KERNEL_OK")
</pallas_src>

<mosaic_0001>
module attributes {stable_mosaic.version = 11 : i64} {
  func.func @stats_kernel(%arg0: i32, %arg1: memref<1x16x16x128xf32, #tpu.memory_space<vmem>>, %arg2: memref<1x2x128xf32, #tpu.memory_space<vmem>>) attributes {dimension_semantics = [#tpu.dimension_semantics<parallel>], iteration_bounds = array<i64: 2>, scalar_prefetch = 0 : i64, scratch_operands = 0 : i64, tpu.core_type = #tpu.core_type<tc>, window_params = [{transform_indices = @transform_0, window_bounds = array<i64: 1, 16, 16, 128>}, {transform_indices = @transform_1, window_bounds = array<i64: 1, 2, 128>}]} {
    %c0 = arith.constant 0 : index
    %c0_0 = arith.constant 0 : index
    %c0_1 = arith.constant 0 : index
    %c0_2 = arith.constant 0 : index
    %0 = vector.load %arg1[%c0, %c0_0, %c0_1, %c0_2] : memref<1x16x16x128xf32, #tpu.memory_space<vmem>>, vector<1x16x16x128xf32>
    %1 = vector.shape_cast %0 : vector<1x16x16x128xf32> to vector<256x128xf32>
    %cst = arith.constant dense<0.000000e+00> : vector<128xf32>
    %2 = vector.multi_reduction <add>, %1, %cst [0] : vector<256x128xf32> to vector<128xf32>
    %3 = vector.shape_cast %2 : vector<128xf32> to vector<1x128xf32>
    %4 = arith.mulf %1, %1 : vector<256x128xf32>
    %cst_3 = arith.constant dense<0.000000e+00> : vector<128xf32>
    %5 = vector.multi_reduction <add>, %4, %cst_3 [0] : vector<256x128xf32> to vector<128xf32>
    %6 = vector.shape_cast %5 : vector<128xf32> to vector<1x128xf32>
    %7 = tpu.concatenate %3, %6 in 0 : vector<1x128xf32>, vector<1x128xf32> -> vector<2x128xf32>
    %8 = vector.shape_cast %7 : vector<2x128xf32> to vector<1x2x128xf32>
    %c0_4 = arith.constant 0 : index
    %c0_5 = arith.constant 0 : index
    %c0_6 = arith.constant 0 : index
    %9 = vector.load %arg2[%c0_4, %c0_5, %c0_6] : memref<1x2x128xf32, #tpu.memory_space<vmem>>, vector<1x2x128xf32>
    tpu.vector_store %arg2[%c0_4, %c0_5, %c0_6], %8 {strides = array<i32>} : memref<1x2x128xf32, #tpu.memory_space<vmem>>, vector<1x2x128xf32>,
    return
  }
  func.func @transform_0(%arg0: i32) -> (i32, i32, i32, i32) {
    %c0_i32 = arith.constant 0 : i32
    %c0_i32_0 = arith.constant 0 : i32
    %c0_i32_1 = arith.constant 0 : i32
    %c0_i32_2 = arith.constant 0 : i32
    return %arg0, %c0_i32, %c0_i32_0, %c0_i32_1 : i32, i32, i32, i32
  }
  func.func @transform_1(%arg0: i32) -> (i32, i32, i32) {
    %c0_i32 = arith.constant 0 : i32
    %c0_i32_0 = arith.constant 0 : i32
    %c0_i32_1 = arith.constant 0 : i32
    return %arg0, %c0_i32, %c0_i32_0 : i32, i32, i32
  }
}

</mosaic_0001>

<bundles_post_ra>
// kernel: tpu_custom_call.1
= control target key start
LH: loop header
LB: loop body
LE: loop exit
PB: predicated region body
PF: predicated region fallthrough
CT: control target
= control target key end

     0   :  { %6 = vsyncpa [#allocation3], 0  ;;  %s729_s0 = inlined_call_operand.hbm [shape: f32[2,16,16,128], index: 0, kind: input, shape index: {}]   ;;  %s730_s1 = inlined_call_operand.hbm [shape: f32[2,2,128], index: 1, kind: output, shape index: {}]  }
   0x1   :  { %8 = vsyncpa [#allocation3 + $0x1], 0 }
   0x2   :  { %9 = vsyncpa [#allocation4], 0 }
   0x3   :  { %11 = vsyncpa [#allocation4 + $0x1], 0  ;;  %s534_s6 = smov 0   ;;  %s536_s7 = smov 0  }
   0x4   :  { %s538_s8 = smov 0   ;;  %s540_s9 = smov 0  }
   0x5 LB: > { %s555_s10 = sadd.s32 4294967295, %s518_s9   ;;  %s360_s11 = sadd.s32 4294967294, %s518_s9   ;;  %s518_s9 = sphi %s540_s9, %s743_s9   ;;  %s514_s8 = sphi %s538_s8, %s742_s8   ;;  %s510_s7 = sphi %s536_s7, %s741_s7   ;;  %s506_s6 = sphi %s534_s6, %s740_s6  }
   0x6   : > { %s559_s12 = sadd.s32 1, %s518_s9   ;;  %s24_s13 = sadd.s32 1, %s514_s8 }
   0x7   : > { %s21_s14 = ssub.s32 %s518_s9, %s559_s12  ;;  %p31_p0 = scmp.ne.s32.totalorder %s514_s8, %s510_s7 }
   0x8   : > { %p22_p1 = scmp.eq.s32.totalorder %s21_s14, 0  ;;  %p32_p2 = scmp.eq.s32.totalorder %s518_s9, 0 }
   0x9   : > { %p37_p3 = scmp.ne.s32.totalorder %s510_s7, %s506_s6  ;;  %p38_p4 = scmp.eq.s32.totalorder %s555_s10, 0 }
   0xa   : > { %s571_s15 = scalar_select %p22_p1, %s514_s8, %s24_s13  }
   0xb   : > { %p573_p5 = por %p32_p2, %p31_p0  ;;  %p577_p6 = por %p38_p4, %p37_p3 }
   0xc   : > { %p61_p7 = scmp.eq.s32.totalorder %s555_s10, 1  ;;  %p67_p8 = scmp.eq.s32.totalorder %s360_s11, 1 }
   0xd   : > { %p386_p10 = scmp.lt.s32.totalorder %s518_s9, 2  ;;  %s87_s20 = sand.u32 1, %s514_s8  }
   0xe   : > { %p584_p11 = por %p61_p7, %p31_p0  ;;  %p588_p12 = por %p67_p8, %p37_p3 }
   0xf   : > { %s373_s21 = sshll.u32 %s518_s9, 12  ;;  %s363_s22 = sshll.u32 %s87_s20, 8 }
  0x10   : > { %s734_s18 = scalar_select %p584_p11, 1, 0 }
  0x11   : > { %s735_s19 = scalar_select %p588_p12, 1, 0 }
  0x12   : > { %s597_s25 = scalar_lea.hbm %s729_s0, %s373_s21  ;;  %s91_s26 = scalar_lea.vmem [#allocation2], %s363_s22 }
  0x13   : > { %s98_s27 = sshll.u32 %s91_s26, 4  ;;  %p601_p13 = pnand %p386_p10, %p573_p5  ;;  %s605_s27 = int_to_ptr.vmem [resolvable:$true] %s98_s27 }
  0x14   : > { %s607_s29 = scalar_lea.sflag [#allocation3], %s87_s20  ;;  %s422_s30 = scalar_lea.hbm %s597_s25, 4096 }
  0x15   : > { %p423_p0 = scmp.ne.s32.totalorder %s597_s25, %s422_s30  ;;  %p424_p1 = pneg %p601_p13 }
  0x16   : > { %s427_s4 = scalar_lea.hbm %s729_s0, 8192  ;;  %p428_p4 = scmp.lt.u32.totalorder %s597_s25, %s729_s0 }
  0x17   : > { %p425_p2 = pnand %p424_p1, %p423_p0  ;;  %p429_p5 = scmp.lt.u32.totalorder %s427_s4, %s422_s30 }
  0x18   : > { %p431_p8 = scmp.lt.u32.totalorder %s422_s30, %s597_s25 }
  0x19   : > { %p426_p3 = pneg %p425_p2  ;;  %p430_p7 = por %p429_p5, %p428_p4 }
  0x1b   : > { %p432_p10 = por %p431_p8, %p430_p7 }
  0x1d   : > { %p433_p9 = pnand %p432_p10, %p426_p3 }
  0x1f   : > { %436 = shalt.err (!%p433_p9)
}
  0x20   : > { %s437_s13 = scalar_lea.vmem %s605_s27, 4096  ;;  %s520_s14 = smov [#allocation2]  }
  0x21   : > { %p438_p0 = scmp.ne.s32.totalorder %s605_s27, %s437_s13  ;;  %s442_s16 = sshll.u32 %s520_s14, 4  ;;  %s443_s16 = int_to_ptr.vmem [resolvable:$false] %s442_s16 }
  0x22   : > { %s444_s20 = scalar_lea.vmem %s443_s16, 8192  ;;  %p445_p11 = scmp.lt.s32.totalorder %s605_s27, %s443_s16 }
  0x23   : > { %p440_p2 = pnand %p438_p0, %p424_p1  ;;  %p446_p4 = scmp.lt.s32.totalorder %s444_s20, %s437_s13 }
  0x25   : > { %p441_p12 = pneg %p440_p2  ;;  %p447_p5 = por %p446_p4, %p445_p11 }
  0x27   : > { %p448_p7 = pnand %p447_p5, %p441_p12 }
  0x29   : > { %451 = shalt.err (!%p448_p7)
}
  0x2a   : > { %s521_s21 = smov 128   ;;  %s522_s22 = smov 8  }
  0x2b   : > { %381 = dma.hbm_to_vmem [thread:$0]  (!%p601_p13), %s597_s25, 4096, %s605_s27, %s607_s29, %s521_s21, %s521_s21, %s522_s22  }
  0x2c   : > { %p366_p9 = scmp.ge.s32.totalorder %s518_s9, 1  ;;  %p106_p1 = scmp.lt.s32.totalorder %s518_s9, 3 }
  0x2e   : > { %p107_p3 = pnand %p366_p9, %p106_p1 }
  0x2f   : > { %s638_s23 = sand.u32 (!%p107_p3), 1, %s510_s7  }
  0x30   : > { %110 = sbr.rel (%p107_p3) target bundleno = 148 (0x94), region = 24  ;;  %s367_s24 = sshll.u32 (!%p107_p3), %s638_s23, 8 }
  0x31   : > { %s113_s26 = scalar_lea.sflag (!%p107_p3), [#allocation3], %s638_s23  ;;  %s642_s30 = scalar_lea.vmem (!%p107_p3), [#allocation2], %s367_s24 }
  0x37   : > { %497 = dma.done.wait (%p577_p6), %s113_s26, 4096  }
  0x38   : > { %499 = vsyncadd (%p577_p6), %s113_s26, 4294963200  ;;  %v135_v0 = vld [vmem:[%s642_s30] sm:$0xff]  ;;  %v136_v1 = vld [vmem:[%s642_s30 + $0x8] sm:$0xff]  ;;  %s368_s17 = sshll.u32 %s638_s23, 1  ;;  %s370_s28 = sshll.u32 %s555_s10, 5  ;;  %vm273_vm0 = vcmask 1040384  }
  0x39   : > { %v137_v2 = vld [vmem:[%s642_s30 + $0x10] sm:$0xff]  ;;  %v138_v3 = vld [vmem:[%s642_s30 + $0x18] sm:$0xff]  ;;  %v167_v4 = vadd.f32 %v136_v1, %v135_v0  ;;  %v204_v5 = vmul.f32 %v135_v0, %v135_v0  ;;  %v205_v6 = vmul.f32 %v136_v1, %v136_v1  ;;  %v139_v8 = vld [vmem:[%s642_s30 + $0x20] sm:$0xff]  ;;  %s134_s25 = scalar_lea.vmem [#allocation5], %s368_s17  ;;  %s687_s3 = scalar_lea.hbm %s730_s1, %s370_s28 }
  0x3a   : > { %v206_v7 = vmul.f32 %v137_v2, %v137_v2  ;;  %v207_v10 = vmul.f32 %v138_v3, %v138_v3  ;;  %v140_v12 = vld [vmem:[%s642_s30 + $0x28] sm:$0xff]  ;;  %v208_v14 = vmul.f32 %v139_v8, %v139_v8  ;;  %v141_v16 = vld [vmem:[%s642_s30 + $0x30] sm:$0xff]  ;;  %v142_v20 = vld [vmem:[%s642_s30 + $0x38] sm:$0xff]  ;;  %s290_s27 = sshll.u32 %s134_s25, 4  ;;  %s277_s4 = scalar_lea.sflag [#allocation4], %s638_s23  ;;  %s682_s27 = int_to_ptr.vmem [resolvable:$true] %s290_s27 }
  0x3b   : > { %v168_v9 = vadd.f32 %v167_v4, %v137_v2  ;;  %v236_v11 = vadd.f32 %v205_v6, %v204_v5  ;;  %v209_v18 = vmul.f32 %v140_v12, %v140_v12  ;;  %v210_v22 = vmul.f32 %v141_v16, %v141_v16  ;;  %v143_v24 = vld [vmem:[%s642_s30 + $0x40] sm:$0xff]  ;;  %v144_v28 = vld [vmem:[%s642_s30 + $0x48] sm:$0xff]  ;;  %v145_v32 = vld [vmem:[%s642_s30 + $0x50] sm:$0xff]  ;;  %s452_s5 = scalar_lea.vmem %s682_s27, 32  ;;  %p737_p11 = scmp.ne.s32.totalorder %s734_s18, 0 }
  0x3c   : > { %v211_v26 = vmul.f32 %v142_v20, %v142_v20  ;;  %v212_v30 = vmul.f32 %v143_v24, %v143_v24  ;;  %v213_v34 = vmul.f32 %v144_v28, %v144_v28  ;;  %v146_v36 = vld [vmem:[%s642_s30 + $0x58] sm:$0xff]  ;;  %v214_v38 = vmul.f32 %v145_v32, %v145_v32  ;;  %v147_v40 = vld [vmem:[%s642_s30 + $0x60] sm:$0xff]  ;;  %v148_v44 = vld [vmem:[%s642_s30 + $0x68] sm:$0xff]  ;;  %p453_p6 = scmp.ne.s32.totalorder %s682_s27, %s452_s5  ;;  %s523_s10 = smov [#allocation5]  }
  0x3d   : > { %v169_v13 = vadd.f32 %v168_v9, %v138_v3  ;;  %v237_v15 = vadd.f32 %v236_v11, %v206_v7  ;;  %v215_v42 = vmul.f32 %v146_v36, %v146_v36  ;;  %v216_v46 = vmul.f32 %v147_v40, %v147_v40  ;;  %v149_v48 = vld [vmem:[%s642_s30 + $0x70] sm:$0xff]  ;;  %v150_v52 = vld [vmem:[%s642_s30 + $0x78] sm:$0xff]  ;;  %v151_v56 = vld [vmem:[%s642_s30 + $0x80] sm:$0xff]  ;;  %s456_s11 = sshll.u32 %s523_s10, 4  ;;  %s457_s11 = int_to_ptr.vmem [resolvable:$false] %s456_s11 }
  0x3e   : > { %v217_v50 = vmul.f32 %v148_v44, %v148_v44  ;;  %v218_v54 = vmul.f32 %v149_v48, %v149_v48  ;;  %v219_v58 = vmul.f32 %v150_v52, %v150_v52  ;;  %v152_v60 = vld [vmem:[%s642_s30 + $0x88] sm:$0xff]  ;;  %v220_v62 = vmul.f32 %v151_v56, %v151_v56  ;;  %v153_v0 = vld [vmem:[%s642_s30 + $0x90] sm:$0xff]  ;;  %v154_v4 = vld [vmem:[%s642_s30 + $0x98] sm:$0xff]  ;;  %p454_p12 = pnand %p453_p6, %p737_p11  ;;  %s458_s13 = scalar_lea.vmem %s457_s11, 64 }
  0x3f   : > { %v170_v17 = vadd.f32 %v169_v13, %v139_v8  ;;  %v238_v19 = vadd.f32 %v237_v15, %v207_v10  ;;  %v221_v2 = vmul.f32 %v152_v60, %v152_v60  ;;  %v222_v6 = vmul.f32 %v153_v0, %v153_v0  ;;  %v155_v8 = vld [vmem:[%s642_s30 + $0xa0] sm:$0xff]  ;;  %p459_p8 = scmp.lt.s32.totalorder %s682_s27, %s457_s11  ;;  %p460_p10 = scmp.lt.s32.totalorder %s458_s13, %s452_s5 }
  0x40   : > { %v223_v10 = vmul.f32 %v154_v4, %v154_v4  ;;  %p455_p13 = pneg %p454_p12 }
  0x41   : > { %v171_v21 = vadd.f32 %v170_v17, %v140_v12  ;;  %v239_v23 = vadd.f32 %v238_v19, %v208_v14  ;;  %v156_v12 = vld [vmem:[%s642_s30 + $0xa8] sm:$0xff]  ;;  %v224_v14 = vmul.f32 %v155_v8, %v155_v8  ;;  %p461_p0 = por %p460_p10, %p459_p8 }
  0x43   : > { %v172_v25 = vadd.f32 %v171_v21, %v141_v16  ;;  %v240_v27 = vadd.f32 %v239_v23, %v209_v18  ;;  %v157_v16 = vld [vmem:[%s642_s30 + $0xb0] sm:$0xff]  ;;  %v225_v18 = vmul.f32 %v156_v12, %v156_v12  ;;  %p462_p2 = pnand %p461_p0, %p455_p13 }
  0x45   : > { %v173_v29 = vadd.f32 %v172_v25, %v142_v20  ;;  %v241_v31 = vadd.f32 %v240_v27, %v210_v22  ;;  %v158_v20 = vld [vmem:[%s642_s30 + $0xb8] sm:$0xff]  ;;  %v226_v22 = vmul.f32 %v157_v16, %v157_v16 }
  0x47   : > { %v174_v33 = vadd.f32 %v173_v29, %v143_v24  ;;  %v242_v35 = vadd.f32 %v241_v31, %v211_v26  ;;  %v159_v24 = vld [vmem:[%s642_s30 + $0xc0] sm:$0xff]  ;;  %v227_v26 = vmul.f32 %v158_v20, %v158_v20 }
  0x49   : > { %v175_v37 = vadd.f32 %v174_v33, %v144_v28  ;;  %v243_v39 = vadd.f32 %v242_v35, %v212_v30  ;;  %v160_v28 = vld [vmem:[%s642_s30 + $0xc8] sm:$0xff]  ;;  %v228_v30 = vmul.f32 %v159_v24, %v159_v24 }
  0x4b   : > { %v176_v41 = vadd.f32 %v175_v37, %v145_v32  ;;  %v244_v43 = vadd.f32 %v243_v39, %v213_v34  ;;  %v161_v32 = vld [vmem:[%s642_s30 + $0xd0] sm:$0xff]  ;;  %v229_v34 = vmul.f32 %v160_v28, %v160_v28 }
  0x4d   : > { %v177_v45 = vadd.f32 %v176_v41, %v146_v36  ;;  %v245_v47 = vadd.f32 %v244_v43, %v214_v38  ;;  %v162_v36 = vld [vmem:[%s642_s30 + $0xd8] sm:$0xff]  ;;  %v230_v38 = vmul.f32 %v161_v32, %v161_v32 }
  0x4f   : > { %v178_v49 = vadd.f32 %v177_v45, %v147_v40  ;;  %v246_v51 = vadd.f32 %v245_v47, %v215_v42  ;;  %v163_v40 = vld [vmem:[%s642_s30 + $0xe0] sm:$0xff]  ;;  %v231_v42 = vmul.f32 %v162_v36, %v162_v36 }
  0x51   : > { %v179_v53 = vadd.f32 %v178_v49, %v148_v44  ;;  %v247_v55 = vadd.f32 %v246_v51, %v216_v46  ;;  %v164_v44 = vld [vmem:[%s642_s30 + $0xe8] sm:$0xff]  ;;  %v232_v46 = vmul.f32 %v163_v40, %v163_v40 }
  0x53   : > { %v180_v57 = vadd.f32 %v179_v53, %v149_v48  ;;  %v248_v59 = vadd.f32 %v247_v55, %v217_v50  ;;  %v165_v48 = vld [vmem:[%s642_s30 + $0xf0] sm:$0xff]  ;;  %v233_v50 = vmul.f32 %v164_v44, %v164_v44 }
  0x55   : > { %v181_v61 = vadd.f32 %v180_v57, %v150_v52  ;;  %v249_v63 = vadd.f32 %v248_v59, %v218_v54  ;;  %v166_v52 = vld [vmem:[%s642_s30 + $0xf8] sm:$0xff]  ;;  %v234_v54 = vmul.f32 %v165_v48, %v165_v48 }
  0x56   : > { %v235_v57 = vmul.f32 %v166_v52, %v166_v52 }
  0x57   : > { %v182_v1 = vadd.f32 %v181_v61, %v151_v56  ;;  %v250_v3 = vadd.f32 %v249_v63, %v219_v58 }
  0x59   : > { %v183_v5 = vadd.f32 %v182_v1, %v152_v60  ;;  %v251_v7 = vadd.f32 %v250_v3, %v220_v62 }
  0x5b   : > { %v184_v9 = vadd.f32 %v183_v5, %v153_v0  ;;  %v252_v11 = vadd.f32 %v251_v7, %v221_v2 }
  0x5d   : > { %v185_v13 = vadd.f32 %v184_v9, %v154_v4  ;;  %v253_v15 = vadd.f32 %v252_v11, %v222_v6 }
  0x5f   : > { %v186_v17 = vadd.f32 %v185_v13, %v155_v8  ;;  %v254_v19 = vadd.f32 %v253_v15, %v223_v10 }
  0x61   : > { %v187_v21 = vadd.f32 %v186_v17, %v156_v12  ;;  %v255_v23 = vadd.f32 %v254_v19, %v224_v14 }
  0x63   : > { %v188_v25 = vadd.f32 %v187_v21, %v157_v16  ;;  %v256_v27 = vadd.f32 %v255_v23, %v225_v18 }
  0x65   : > { %v189_v29 = vadd.f32 %v188_v25, %v158_v20  ;;  %v257_v31 = vadd.f32 %v256_v27, %v226_v22 }
  0x67   : > { %v190_v33 = vadd.f32 %v189_v29, %v159_v24  ;;  %v258_v35 = vadd.f32 %v257_v31, %v227_v26 }
  0x69   : > { %v191_v37 = vadd.f32 %v190_v33, %v160_v28  ;;  %v259_v39 = vadd.f32 %v258_v35, %v228_v30 }
  0x6b   : > { %v192_v41 = vadd.f32 %v191_v37, %v161_v32  ;;  %v260_v43 = vadd.f32 %v259_v39, %v229_v34 }
  0x6d   : > { %v193_v45 = vadd.f32 %v192_v41, %v162_v36  ;;  %v261_v47 = vadd.f32 %v260_v43, %v230_v38 }
  0x6f   : > { %v194_v49 = vadd.f32 %v193_v45, %v163_v40  ;;  %v262_v51 = vadd.f32 %v261_v47, %v231_v42 }
  0x71   : > { %v195_v53 = vadd.f32 %v194_v49, %v164_v44  ;;  %v263_v55 = vadd.f32 %v262_v51, %v232_v46 }
  0x73   : > { %v196_v56 = vadd.f32 %v195_v53, %v165_v48  ;;  %v264_v58 = vadd.f32 %v263_v55, %v233_v50 }
  0x75   : > { %v197_v59 = vadd.f32 %v196_v56, %v166_v52  ;;  %v265_v60 = vadd.f32 %v264_v58, %v234_v54 }
  0x77   : > { %v198_v61 = vrot.slane %v197_v59, 4  ;;  %v266_v62 = vadd.f32 %v265_v60, %v235_v57 }
  0x79   : > { %v199_v63 = vadd.f32 %v198_v61, %v197_v59  ;;  %v267_v0 = vrot.slane %v266_v62, 4 }
  0x7b   : > { %v200_v1 = vrot.slane %v199_v63, 2  ;;  %v268_v2 = vadd.f32 %v267_v0, %v266_v62 }
  0x7d   : > { %v201_v3 = vadd.f32 %v200_v1, %v199_v63  ;;  %v269_v4 = vrot.slane %v268_v2, 2 }
  0x7f   : > { %v202_v5 = vrot.slane %v201_v3, 1  ;;  %v270_v6 = vadd.f32 %v269_v4, %v268_v2 }
  0x81   : > { %v203_v7 = vadd.f32 %v202_v5, %v201_v3  ;;  %v271_v8 = vrot.slane %v270_v6, 1 }
  0x83   : > { %v272_v9 = vadd.f32 %v271_v8, %v270_v6 }
  0x85   : > { %v274_v10 = vsel %vm273_vm0, %v203_v7, %v272_v9 }
  0x86   : > { %275 = vst [vmem:[%s134_s25] sm:$0x3] %v274_v10 }
  0x87   : > { %465 = shalt.err (!%p462_p2)
}
  0x88   : > { %s466_s14 = scalar_lea.hbm %s687_s3, 32  ;;  %s470_s21 = scalar_lea.hbm %s730_s1, 64 }
  0x89   : > { %p467_p4 = scmp.ne.s32.totalorder %s687_s3, %s466_s14  ;;  %p471_p9 = scmp.lt.u32.totalorder %s687_s3, %s730_s1 }
  0x8a   : > { %p472_p1 = scmp.lt.u32.totalorder %s470_s21, %s466_s14  ;;  %p474_p6 = scmp.lt.u32.totalorder %s466_s14, %s687_s3 }
  0x8b   : > { %p468_p5 = pnand %p467_p4, %p737_p11 }
  0x8c   : > { %p473_p3 = por %p472_p1, %p471_p9 }
  0x8d   : > { %p469_p7 = pneg %p468_p5 }
  0x8e   : > { %p475_p12 = por %p474_p6, %p473_p3 }
  0x90   : > { %p476_p13 = pnand %p475_p12, %p469_p7 }
  0x92   : > { %479 = shalt.err (!%p476_p13)
}
  0x93   : > { %376 = dma.vmem_to_hbm [thread:$0]  (%p737_p11), %s682_s27, 32, %s687_s3, %s277_s4  }
  0x94 PF: > { %s302_s24 = sand.u32 1, %s506_s6   ;;  %p738_p8 = scmp.ne.s32.totalorder %s735_s19, 0 }
  0x95   : > { %p739_p10 = scmp.ge.s32.totalorder %s518_s9, 2  ;;  %s303_s26 = scalar_lea.sflag [#allocation4], %s302_s24 }
  0x97   : > { %p383_p0 = pnand %p739_p10, %p738_p8 }
  0x99   : > { %501 = dma.done.wait (!%p383_p0), %s303_s26, 32  }
  0x9a   : > { %503 = vsyncadd (!%p383_p0), %s303_s26, 4294967264  ;;  %p14_p2 = scmp.ge.s32.totalorder %s559_s12, 4   ;;  %s740_s6 = smov %s510_s7 }
  0x9b   : > { %s741_s7 = smov %s514_s8  ;;  %s742_s8 = smov %s571_s15 }
  0x9c   : > { %s743_s9 = smov %s559_s12  ;;  %16 = sbr.rel (!%p14_p2) target bundleno = 5 (0x5), region = 69 }
  0xa3   :  { %308 = vsyncpa [#allocation3], 1 }
  0xa4   :  { %310 = vsyncpa [#allocation3 + $0x1], 1 }
  0xa5   :  { %311 = vsyncpa [#allocation4], 1 }
  0xa6   :  { %313 = vsyncpa [#allocation4 + $0x1], 1 }

</bundles_post_ra>
